<compile_context>
chip_gen: v7x
topology: tpu7x:2x2x1
jax: 0.10.0
libtpu: 0.0.40
codegen_flags: <defaults>
</compile_context>

<pallas_src>
import jax
import jax.numpy as jnp
from jax.experimental import pallas as pl
from jax.experimental.pallas import tpu as pltpu


# ---------------------------------------------------------------------------
# Dense (Linear) kernel: out = x @ w + b.
# Used for the down/up projections, which are independent of the recurrence.
# ---------------------------------------------------------------------------
def _dense_kernel(x_ref, w_ref, b_ref, o_ref):
  x = x_ref[...].astype(w_ref.dtype)          # bf16 MXU operands when enabled
  acc = jnp.dot(x, w_ref[...], preferred_element_type=jnp.float32)
  o_ref[...] = (acc + b_ref[...]).astype(o_ref.dtype)


def _dense(x2, w, b):
  """x2: (M, K) f32, w: (K, N), b: (1, N) f32 -> (M, N) f32."""
  M, K = x2.shape
  _, N = w.shape
  # Split the output columns over the grid when wide enough so the
  # non-recurrent projection can be sharded across TensorCores (v7x megacore).
  bn = N // 2 if (N % 256 == 0) else N
  grid = (N // bn,)
  return pl.pallas_call(
      _dense_kernel,
      out_shape=jax.ShapeDtypeStruct((M, N), jnp.float32),
      grid_spec=pltpu.PrefetchScalarGridSpec(
          num_scalar_prefetch=0,
          grid=grid,
          in_specs=[
              pl.BlockSpec((M, K), lambda j: (0, 0)),
              pl.BlockSpec((K, bn), lambda j: (0, j)),
              pl.BlockSpec((1, bn), lambda j: (0, j)),
          ],
          out_specs=pl.BlockSpec((M, bn), lambda j: (0, j)),
      ),
      compiler_params=pltpu.CompilerParams(
          dimension_semantics=("parallel",)),
  )(x2, w, b)


# ---------------------------------------------------------------------------
# Stacked-LSTM recurrence kernel: single grid step, unrolled time loop.
#   x_ref  : (B, S*H)       time step t occupies lanes [t*H, (t+1)*H)
#   wg_ref : (L, 2H, 4H)    fused [W_ih; W_hh] per layer (gate order i,f,g,o)
#   bg_ref : (L, 1, 4H)     b_ih + b_hh per layer (float32)
#   out_ref: (B, S*H)       top-layer hidden states, same lane packing
# ---------------------------------------------------------------------------
def _lstm_recurrence_kernel(x_ref, wg_ref, bg_ref, out_ref):
  L, two_h, _ = wg_ref.shape
  H = two_h // 2
  B = x_ref.shape[0]
  S = x_ref.shape[1] // H

  # Hoist weight / bias loads out of the unrolled time loop.
  wg = [wg_ref[l] for l in range(L)]          # (2H, 4H) each (f32 or bf16)
  bg = [bg_ref[l] for l in range(L)]          # (1, 4H) f32

  xs = x_ref[...]                             # (B, S*H) f32, loaded once

  h = [jnp.zeros((B, H), jnp.float32) for _ in range(L)]
  c = [jnp.zeros((B, H), jnp.float32) for _ in range(L)]

  outs = []
  for t in range(S):                          # fully unrolled recurrence
    inp = xs[:, t * H:(t + 1) * H]            # (B, H) static lane slice
    for l in range(L):
      # One fused gate matmul per layer: (B, 2H) @ (2H, 4H).
      z = jnp.concatenate([inp, h[l]], axis=-1).astype(wg[l].dtype)
      gates = (jnp.dot(z, wg[l], preferred_element_type=jnp.float32)
               + bg[l])                       # (B, 4H) f32
      i_g = jax.nn.sigmoid(gates[:, 0 * H:1 * H])
      f_g = jax.nn.sigmoid(gates[:, 1 * H:2 * H])
      g_g = jnp.tanh(gates[:, 2 * H:3 * H])
      o_g = jax.nn.sigmoid(gates[:, 3 * H:4 * H])
      c[l] = f_g * c[l] + i_g * g_g           # elementwise kept f32 (v5e-safe)
      h[l] = o_g * jnp.tanh(c[l])
      inp = h[l]
    outs.append(inp)

  # Single lane-dense store of all time steps.
  out_ref[...] = jnp.concatenate(outs, axis=-1).astype(out_ref.dtype)


# ---------------------------------------------------------------------------
# Forward pass wrapper (batch-first x, like nn.LSTM(batch_first=True)).
# ---------------------------------------------------------------------------
def scar_lstm_forward(x, params, *, hidden_size, num_layers, out_size=768,
                      weight_dtype=jnp.float32):
  """x: (B, S, in_size) float32 -> (B, S, out_size) float32."""
  w_down, b_down, w_ih, w_hh, b_gates, w_up, b_up = params
  B, S, IN = x.shape
  H = hidden_size
  L = num_layers

  # Fuse per-layer input/hidden gate weights into one (2H, 4H) operand.
  w_g = jnp.concatenate([w_ih, w_hh], axis=1)               # (L, 2H, 4H)

  # Optional bf16 MXU operands (v6e/v7x); biases and accumulation stay f32.
  w_down_c = w_down.astype(weight_dtype)
  w_g_c = w_g.astype(weight_dtype)
  w_up_c = w_up.astype(weight_dtype)

  # Down projection, hoisted off the recurrence: one (B*S, IN) @ (IN, H).
  xs2 = _dense(x.reshape(B * S, IN), w_down_c, b_down)      # (B*S, H)

  # Recurrence: single grid step, batch-first lane-packed layout (free reshape).
  xs2d = xs2.reshape(B, S * H)
  hs2d = pl.pallas_call(
      _lstm_recurrence_kernel,
      out_shape=jax.ShapeDtypeStruct((B, S * H), jnp.float32),
      grid_spec=pltpu.PrefetchScalarGridSpec(
          num_scalar_prefetch=0,
          grid=(1,),
          in_specs=[
              pl.BlockSpec((B, S * H), lambda i: (0, 0)),
              pl.BlockSpec((L, 2 * H, 4 * H), lambda i: (0, 0, 0)),
              pl.BlockSpec((L, 1, 4 * H), lambda i: (0, 0, 0)),
          ],
          out_specs=pl.BlockSpec((B, S * H), lambda i: (0, 0)),
      ),
      compiler_params=pltpu.CompilerParams(
          dimension_semantics=("arbitrary",)),                # serial recurrence
  )(xs2d, w_g_c, b_gates)

  # Up projection, hoisted off the recurrence: one (B*S, H) @ (H, 768).
  y2 = _dense(hs2d.reshape(B * S, H), w_up, b_up)            # wait: use casted
  # (re-run with casted weight to keep bf16 option consistent)
  y2 = _dense(hs2d.reshape(B * S, H), w_up_c, b_up)          # (B*S, OUT)
  return y2.reshape(B, S, out_size)


# ---------------------------------------------------------------------------
# Pure-JAX reference (float32) for correctness checking.
# ---------------------------------------------------------------------------
def scar_lstm_reference(x, params, *, hidden_size, num_layers):
  w_down, b_down, w_ih, w_hh, b_gates, w_up, b_up = params
  H = hidden_size
  L = num_layers
  B, S, _ = x.shape

  xs = x @ w_down + b_down[0]                          # (B, S, H)
  h0 = jnp.zeros((L, B, H), jnp.float32)
  c0 = jnp.zeros((L, B, H), jnp.float32)

  def step(carry, x_t):
    h, c = carry
    inp = x_t
    hs, cs = [], []
    for l in range(L):
      gates = inp @ w_ih[l] + h[l] @ w_hh[l] + b_gates[l, 0]
      i_g = jax.nn.sigmoid(gates[:, 0 * H:1 * H])
      f_g = jax.nn.sigmoid(gates[:, 1 * H:2 * H])
      g_g = jnp.tanh(gates[:, 2 * H:3 * H])
      o_g = jax.nn.sigmoid(gates[:, 3 * H:4 * H])
      c_new = f_g * c[l] + i_g * g_g
      h_new = o_g * jnp.tanh(c_new)
      hs.append(h_new)
      cs.append(c_new)
      inp = h_new
    return (jnp.stack(hs), jnp.stack(cs)), inp

  (_, _), outs = jax.lax.scan(step, (h0, c0), jnp.transpose(xs, (1, 0, 2)))
  y = outs @ w_up + b_up[0]                            # (S, B, OUT)
  return jnp.transpose(y, (1, 0, 2))


def init_params(key, *, in_size, hidden_size, num_layers, out_size=768):
  """Synthetic params.  Weights stored (in, out); b_gates = b_ih + b_hh."""
  H = hidden_size
  ks = jax.random.split(key, 7)
  scale = 0.1
  w_down = scale * jax.random.normal(ks[0], (in_size, H), jnp.float32)
  b_down = scale * jax.random.normal(ks[1], (1, H), jnp.float32)
  w_ih = scale * jax.random.normal(ks[2], (num_layers, H, 4 * H), jnp.float32)
  w_hh = scale * jax.random.normal(ks[3], (num_layers, H, 4 * H), jnp.float32)
  b_gates = scale * jax.random.normal(ks[4], (num_layers, 1, 4 * H), jnp.float32)
  w_up = scale * jax.random.normal(ks[5], (H, out_size), jnp.float32)
  b_up = scale * jax.random.normal(ks[6], (1, out_size), jnp.float32)
  return (w_down, b_down, w_ih, w_hh, b_gates, w_up, b_up)


if __name__ == "__main__":
  # Shapes consistent with the module: x (batch=2, seq=8, in_size=768),
  # hidden_size=32, num_layers=2, out=768.
  B, S, IN = 2, 8, 768
  HIDDEN = 32
  LAYERS = 2

  key = jax.random.PRNGKey(0)
  kx, kp = jax.random.split(key)
  x = jax.random.normal(kx, (B, S, IN), jnp.float32)
  params = init_params(kp, in_size=IN, hidden_size=HIDDEN, num_layers=LAYERS)

  # Strict check: full-float32 kernel path vs. pure-JAX reference.
  y = scar_lstm_forward(x, params, hidden_size=HIDDEN, num_layers=LAYERS)
  y = jax.block_until_ready(y)
  y_ref = scar_lstm_reference(x, params, hidden_size=HIDDEN, num_layers=LAYERS)
  assert y.shape == (B, S, 768)
  assert jnp.allclose(y, y_ref, atol=2e-4, rtol=2e-4), "f32 mismatch vs reference"

  # Looser check: bf16 MXU-operand path (v6e/v7x optimization); state and
  # elementwise math remain f32, so only small matmul-operand rounding differs.
  y_bf16 = scar_lstm_forward(x, params, hidden_size=HIDDEN, num_layers=LAYERS,
                             weight_dtype=jnp.bfloat16)
  y_bf16 = jax.block_until_ready(y_bf16)
  assert jnp.allclose(y_bf16, y_ref, atol=1e-1, rtol=1e-1), "bf16 path diverged"

  print("KERNEL_OK")
</pallas_src>

<mosaic_0001>
module attributes {stable_mosaic.version = 11 : i64} {
  func.func @_dense_kernel(%arg0: i32, %arg1: memref<16x768xf32, #tpu.memory_space<vmem>>, %arg2: memref<768x32xf32, #tpu.memory_space<vmem>>, %arg3: memref<1x32xf32, #tpu.memory_space<vmem>>, %arg4: memref<16x32xf32, #tpu.memory_space<vmem>>) attributes {dimension_semantics = [#tpu.dimension_semantics<parallel>], iteration_bounds = array<i64: 1>, scalar_prefetch = 0 : i64, scratch_operands = 0 : i64, tpu.core_type = #tpu.core_type<tc>, window_params = [{pipeline_mode = #tpu.pipeline_mode<synchronous>, transform_indices = @transform_0, window_bounds = array<i64: 16, 768>}, {transform_indices = @transform_1, window_bounds = array<i64: 768, 32>}, {transform_indices = @transform_2, window_bounds = array<i64: 1, 32>}, {transform_indices = @transform_3, window_bounds = array<i64: 16, 32>}]} {
    %c0 = arith.constant 0 : index
    %c0_0 = arith.constant 0 : index
    %0 = vector.load %arg1[%c0, %c0_0] : memref<16x768xf32, #tpu.memory_space<vmem>>, vector<16x768xf32>
    %c0_1 = arith.constant 0 : index
    %c0_2 = arith.constant 0 : index
    %1 = vector.load %arg2[%c0_1, %c0_2] : memref<768x32xf32, #tpu.memory_space<vmem>>, vector<768x32xf32>
    %cst = arith.constant dense<0.000000e+00> : vector<16x32xf32>
    %2 = tpu.matmul %0, %1, %cst {dimension_numbers = #tpu.dot_dimension_numbers<[1], [0], [0], [1], [0, 0, 1, 1], [], []>} : vector<16x768xf32>, vector<768x32xf32>, vector<16x32xf32> -> vector<16x32xf32>
    %c0_3 = arith.constant 0 : index
    %c0_4 = arith.constant 0 : index
    %3 = vector.load %arg3[%c0_3, %c0_4] : memref<1x32xf32, #tpu.memory_space<vmem>>, vector<1x32xf32>
    %4 = vector.broadcast %3 : vector<1x32xf32> to vector<16x32xf32>
    %5 = arith.addf %2, %4 : vector<16x32xf32>
    %c0_5 = arith.constant 0 : index
    %c0_6 = arith.constant 0 : index
    %6 = vector.load %arg4[%c0_5, %c0_6] : memref<16x32xf32, #tpu.memory_space<vmem>>, vector<16x32xf32>
    tpu.vector_store %arg4[%c0_5, %c0_6], %5 {strides = array<i32>} : memref<16x32xf32, #tpu.memory_space<vmem>>, vector<16x32xf32>,
    return
  }
  func.func @transform_0(%arg0: i32) -> (i32, i32) {
    %c0_i32 = arith.constant 0 : i32
    %c0_i32_0 = arith.constant 0 : i32
    %c0_i32_1 = arith.constant 0 : i32
    return %c0_i32, %c0_i32_0 : i32, i32
  }
  func.func @transform_1(%arg0: i32) -> (i32, i32) {
    %c0_i32 = arith.constant 0 : i32
    %c0_i32_0 = arith.constant 0 : i32
    return %c0_i32, %arg0 : i32, i32
  }
  func.func @transform_2(%arg0: i32) -> (i32, i32) {
    %c0_i32 = arith.constant 0 : i32
    %c0_i32_0 = arith.constant 0 : i32
    return %c0_i32, %arg0 : i32, i32
  }
  func.func @transform_3(%arg0: i32) -> (i32, i32) {
    %c0_i32 = arith.constant 0 : i32
    %c0_i32_0 = arith.constant 0 : i32
    return %c0_i32, %arg0 : i32, i32
  }
}

</mosaic_0001>

<bundles_post_ra>
// kernel: tpu_custom_call.1
= control target key start
LH: loop header
LB: loop body
LE: loop exit
PB: predicated region body
PF: predicated region fallthrough
CT: control target
= control target key end

     0   :  { %s990_s0 = inlined_call_operand.vmem [shape: f32[16,768], index: 0, kind: input, shape index: {}]   ;;  %s991_s1 = inlined_call_operand.vmem [shape: f32[768,32], index: 1, kind: input, shape index: {}]   ;;  %s992_s2 = inlined_call_operand.vmem [shape: f32[1,32], index: 2, kind: input, shape index: {}]   ;;  %s993_s3 = inlined_call_operand.hbm [shape: f32[16,32], index: 3, kind: output, shape index: {}]  }
   0x1   :  { %v43_v0 = vld [vmem:[%s991_s1 + $0x80] sm:$0xff]  ;;  %v44_v1 = vld [vmem:[%s991_s1 + $0x88] sm:$0xff]  ;;  %v45_v11 = vld [vmem:[%s991_s1 + $0x90] sm:$0xff] }
   0x2   :  { %v75_v2 = vld [vmem:[%s991_s1 + $0x180] sm:$0xff]  ;;  %v489_v3 = vpack.c.bf16 %v44_v1, %v43_v0  ;;  %v76_v4 = vld [vmem:[%s991_s1 + $0x188] sm:$0xff]  ;;  %v46_v13 = vld [vmem:[%s991_s1 + $0x98] sm:$0xff] }
   0x3   :  { %v27_v5 = vld [vmem:[%s991_s1] sm:$0xff]  ;;  %v28_v6 = vld [vmem:[%s991_s1 + $0x8] sm:$0xff]  ;;  %v521_v7 = vpack.c.bf16 %v76_v4, %v75_v2  ;;  %v77_v14 = vld [vmem:[%s991_s1 + $0x190] sm:$0xff]  ;;  %v493_v16 = vpack.c.bf16 %v46_v13, %v45_v11 }
   0x4   :  { %v491_v8 = vpack.c.bf16 %v28_v6, %v27_v5  ;;  %v59_v9 = vld [vmem:[%s991_s1 + $0x100] sm:$0xff]  ;;  %v60_v10 = vld [vmem:[%s991_s1 + $0x108] sm:$0xff]  ;;  %490 = vmatprep.subr.bf16.mxu0 %v489_v3  ;;  %v78_v15 = vld [vmem:[%s991_s1 + $0x198] sm:$0xff] }
   0x5   :  { %v523_v12 = vpack.c.bf16 %v60_v10, %v59_v9  ;;  %522 = vmatprep.subr.bf16.mxu1 %v521_v7  ;;  %v525_v17 = vpack.c.bf16 %v78_v15, %v77_v14  ;;  %v29_v18 = vld [vmem:[%s991_s1 + $0x10] sm:$0xff]  ;;  %v30_v19 = vld [vmem:[%s991_s1 + $0x18] sm:$0xff]  ;;  %v47_v23 = vld [vmem:[%s991_s1 + $0xa0] sm:$0xff] }
   0x6   :  { %492 = vmatpush3.bf16.msra.mxu0 %v491_v8  ;;  %v61_v20 = vld [vmem:[%s991_s1 + $0x110] sm:$0xff]  ;;  %v495_v21 = vpack.c.bf16 %v30_v19, %v29_v18  ;;  %v62_v22 = vld [vmem:[%s991_s1 + $0x118] sm:$0xff]  ;;  %v48_v24 = vld [vmem:[%s991_s1 + $0xa8] sm:$0xff] }
   0x7   :  { %524 = vmatpush3.bf16.msra.mxu1 %v523_v12  ;;  %494 = vmatprep.subr.bf16.mxu0 %v493_v16  ;;  %v527_v25 = vpack.c.bf16 %v62_v22, %v61_v20  ;;  %v497_v26 = vpack.c.bf16 %v48_v24, %v47_v23  ;;  %v79_v27 = vld [vmem:[%s991_s1 + $0x1a0] sm:$0xff]  ;;  %v80_v28 = vld [vmem:[%s991_s1 + $0x1a8] sm:$0xff]  ;;  %v49_v35 = vld [vmem:[%s991_s1 + $0xb0] sm:$0xff] }
   0x8   :  { %526 = vmatprep.subr.bf16.mxu1 %v525_v17  ;;  %v31_v29 = vld [vmem:[%s991_s1 + $0x20] sm:$0xff]  ;;  %v529_v30 = vpack.c.bf16 %v80_v28, %v79_v27  ;;  %v32_v31 = vld [vmem:[%s991_s1 + $0x28] sm:$0xff]  ;;  %v50_v36 = vld [vmem:[%s991_s1 + $0xb8] sm:$0xff] }
   0x9   :  { %v63_v32 = vld [vmem:[%s991_s1 + $0x120] sm:$0xff]  ;;  %v64_v33 = vld [vmem:[%s991_s1 + $0x128] sm:$0xff]  ;;  %v499_v34 = vpack.c.bf16 %v32_v31, %v31_v29  ;;  %v81_v37 = vld [vmem:[%s991_s1 + $0x1b0] sm:$0xff]  ;;  %v501_v39 = vpack.c.bf16 %v50_v36, %v49_v35 }
   0xa   :  { %496 = vmatpush3.bf16.msra.mxu0 %v495_v21  ;;  %v531_v38 = vpack.c.bf16 %v64_v33, %v63_v32  ;;  %v82_v40 = vld [vmem:[%s991_s1 + $0x1b8] sm:$0xff]  ;;  %v33_v41 = vld [vmem:[%s991_s1 + $0x30] sm:$0xff]  ;;  %v51_v46 = vld [vmem:[%s991_s1 + $0xc0] sm:$0xff] }
   0xb   :  { %528 = vmatpush3.bf16.msra.mxu1 %v527_v25  ;;  %498 = vmatprep.subr.bf16.mxu0 %v497_v26  ;;  %v34_v42 = vld [vmem:[%s991_s1 + $0x38] sm:$0xff]  ;;  %v533_v43 = vpack.c.bf16 %v82_v40, %v81_v37  ;;  %v65_v44 = vld [vmem:[%s991_s1 + $0x130] sm:$0xff]  ;;  %v52_v47 = vld [vmem:[%s991_s1 + $0xc8] sm:$0xff] }
   0xc   :  { %530 = vmatprep.subr.bf16.mxu1 %v529_v30  ;;  %v66_v45 = vld [vmem:[%s991_s1 + $0x138] sm:$0xff]  ;;  %v83_v48 = vld [vmem:[%s991_s1 + $0x1c0] sm:$0xff]  ;;  %v84_v49 = vld [vmem:[%s991_s1 + $0x1c8] sm:$0xff]  ;;  %v503_v50 = vpack.c.bf16 %v34_v42, %v33_v41  ;;  %v505_v52 = vpack.c.bf16 %v52_v47, %v51_v46 }
   0xd   :  { %v535_v51 = vpack.c.bf16 %v66_v45, %v65_v44  ;;  %v35_v53 = vld [vmem:[%s991_s1 + $0x40] sm:$0xff]  ;;  %v36_v54 = vld [vmem:[%s991_s1 + $0x48] sm:$0xff]  ;;  %v537_v56 = vpack.c.bf16 %v84_v49, %v83_v48  ;;  %v53_v58 = vld [vmem:[%s991_s1 + $0xd0] sm:$0xff] }
   0xe   :  { %500 = vmatpush3.bf16.msra.mxu0 %v499_v34  ;;  %v67_v55 = vld [vmem:[%s991_s1 + $0x140] sm:$0xff]  ;;  %v68_v57 = vld [vmem:[%s991_s1 + $0x148] sm:$0xff]  ;;  %v54_v59 = vld [vmem:[%s991_s1 + $0xd8] sm:$0xff]  ;;  %v507_v62 = vpack.c.bf16 %v36_v54, %v35_v53 }
   0xf   :  { %532 = vmatpush3.bf16.msra.mxu1 %v531_v38  ;;  %502 = vmatprep.subr.bf16.mxu0 %v501_v39  ;;  %v85_v60 = vld [vmem:[%s991_s1 + $0x1d0] sm:$0xff]  ;;  %v86_v61 = vld [vmem:[%s991_s1 + $0x1d8] sm:$0xff]  ;;  %v539_v63 = vpack.c.bf16 %v68_v57, %v67_v55  ;;  %v509_v0 = vpack.c.bf16 %v54_v59, %v53_v58  ;;  %v55_v6 = vld [vmem:[%s991_s1 + $0xe0] sm:$0xff] }
  0x10   :  { %534 = vmatprep.subr.bf16.mxu1 %v533_v43  ;;  %v37_v1 = vld [vmem:[%s991_s1 + $0x50] sm:$0xff]  ;;  %v38_v2 = vld [vmem:[%s991_s1 + $0x58] sm:$0xff]  ;;  %v541_v4 = vpack.c.bf16 %v86_v61, %v85_v60  ;;  %v56_v7 = vld [vmem:[%s991_s1 + $0xe8] sm:$0xff] }
  0x11   :  { %v69_v3 = vld [vmem:[%s991_s1 + $0x150] sm:$0xff]  ;;  %v70_v5 = vld [vmem:[%s991_s1 + $0x158] sm:$0xff]  ;;  %v87_v8 = vld [vmem:[%s991_s1 + $0x1e0] sm:$0xff]  ;;  %v511_v10 = vpack.c.bf16 %v38_v2, %v37_v1  ;;  %v513_v14 = vpack.c.bf16 %v56_v7, %v55_v6 }
  0x12   :  { %504 = vmatpush3.bf16.msra.mxu0 %v503_v50  ;;  %v88_v9 = vld [vmem:[%s991_s1 + $0x1e8] sm:$0xff]  ;;  %v39_v11 = vld [vmem:[%s991_s1 + $0x60] sm:$0xff]  ;;  %v543_v13 = vpack.c.bf16 %v70_v5, %v69_v3  ;;  %v18_v17 = vld [vmem:[%s990_s0 + $0x18] sm:$0xff] }
  0x13   :  { %536 = vmatpush3.bf16.msra.mxu1 %v535_v51  ;;  %506 = vmatprep.subr.bf16.mxu0 %v505_v52  ;;  %v40_v12 = vld [vmem:[%s991_s1 + $0x68] sm:$0xff]  ;;  %v71_v15 = vld [vmem:[%s991_s1 + $0x160] sm:$0xff]  ;;  %v545_v18 = vpack.c.bf16 %v88_v9, %v87_v8  ;;  %v57_v20 = vld [vmem:[%s991_s1 + $0xf0] sm:$0xff] }
  0x14   :  { %538 = vmatprep.subr.bf16.mxu1 %v537_v56  ;;  %v16_v16 = vld [vmem:[%s990_s0 + $0x8] sm:$0xff]  ;;  %v58_v21 = vld [vmem:[%s991_s1 + $0xf8] sm:$0xff]  ;;  %v89_v22 = vld [vmem:[%s991_s1 + $0x1f0] sm:$0xff]  ;;  %269 = vmatprep.mubr.f32.mxu1 %v18_v17  ;;  %v515_v24 = vpack.c.bf16 %v40_v12, %v39_v11 }
  0x15   :  { %v72_v19 = vld [vmem:[%s991_s1 + $0x168] sm:$0xff]  ;;  %194 = vmatprep.mubr.f32.mxu0 %v16_v16  ;;  %v90_v23 = vld [vmem:[%s991_s1 + $0x1f8] sm:$0xff]  ;;  %v517_v26 = vpack.c.bf16 %v58_v21, %v57_v20  ;;  %v41_v27 = vld [vmem:[%s991_s1 + $0x70] sm:$0xff] }
  0x16   :  { %508 = vmatpush3.bf16.msra.mxu0 %v507_v62  ;;  %v547_v25 = vpack.c.bf16 %v72_v19, %v71_v15  ;;  %v42_v28 = vld [vmem:[%s991_s1 + $0x78] sm:$0xff]  ;;  %v73_v29 = vld [vmem:[%s991_s1 + $0x170] sm:$0xff]  ;;  %v549_v30 = vpack.c.bf16 %v90_v23, %v89_v22  ;;  %v107_v32 = vld [vmem:[%s991_s1 + $0x280] sm:$0xff] }
  0x17   :  { %540 = vmatpush3.bf16.msra.mxu1 %v539_v63  ;;  %510 = vmatprep.subr.bf16.mxu0 %v509_v0  ;;  %v74_v31 = vld [vmem:[%s991_s1 + $0x178] sm:$0xff]  ;;  %v108_v33 = vld [vmem:[%s991_s1 + $0x288] sm:$0xff]  ;;  %v519_v34 = vpack.c.bf16 %v42_v28, %v41_v27  ;;  %v91_v37 = vld [vmem:[%s991_s1 + $0x200] sm:$0xff] }
  0x18   :  { %542 = vmatprep.subr.bf16.mxu1 %v541_v4  ;;  %v551_v35 = vpack.c.bf16 %v74_v31, %v73_v29  ;;  %v553_v36 = vpack.c.bf16 %v108_v33, %v107_v32  ;;  %v92_v38 = vld [vmem:[%s991_s1 + $0x208] sm:$0xff]  ;;  %v109_v39 = vld [vmem:[%s991_s1 + $0x290] sm:$0xff]  ;;  %v110_v40 = vld [vmem:[%s991_s1 + $0x298] sm:$0xff] }
  0x19   :  { %v15_v41 = vld [vmem:[%s990_s0] sm:$0xff]  ;;  %v555_v42 = vpack.c.bf16 %v92_v38, %v91_v37  ;;  %v17_v43 = vld [vmem:[%s990_s0 + $0x10] sm:$0xff]  ;;  %v557_v44 = vpack.c.bf16 %v110_v40, %v109_v39  ;;  %v94_v46 = vld [vmem:[%s991_s1 + $0x218] sm:$0xff] }
  0x1a   :  { %512 = vmatpush3.bf16.msra.mxu0 %v511_v10  ;;  %v93_v45 = vld [vmem:[%s991_s1 + $0x210] sm:$0xff]  ;;  %v111_v47 = vld [vmem:[%s991_s1 + $0x2a0] sm:$0xff]  ;;  %v112_v48 = vld [vmem:[%s991_s1 + $0x2a8] sm:$0xff] }
  0x1b   :  { %544 = vmatpush3.bf16.msra.mxu1 %v543_v13  ;;  %514 = vmatprep.subr.bf16.mxu0 %v513_v14  ;;  %v22_v49 = vld [vmem:[%s990_s0 + $0x38] sm:$0xff]  ;;  %v559_v50 = vpack.c.bf16 %v94_v46, %v93_v45  ;;  %v21_v51 = vld [vmem:[%s990_s0 + $0x30] sm:$0xff]  ;;  %v24_v52 = vld [vmem:[%s990_s0 + $0x48] sm:$0xff] }
  0x1c   :  { %546 = vmatprep.subr.bf16.mxu1 %v545_v18 }
  0x1e   :  { %516 = vmatpush3.bf16.msra.mxu0 %v515_v24 }
  0x1f   :  { %548 = vmatpush3.bf16.msra.mxu1 %v547_v25  ;;  %518 = vmatprep.subr.bf16.mxu0 %v517_v26 }
  0x20   :  { %550 = vmatprep.subr.bf16.mxu1 %v549_v30 }
  0x22   :  { %520 = vmatpush3.bf16.msra.mxu0 %v519_v34 }
  0x23   :  { %552 = vmatpush3.bf16.msra.mxu1 %v551_v35  ;;  %554 = vmatprep.subr.bf16.mxu0 %v553_v36 }
  0x24   :  { %585 = vmatprep.subr.bf16.mxu1 %v553_v36 }
  0x25   :  { %195 = vmatmul.mubr.f32.vlgmr.msra.gmra.mrb[0].mxu0 %v15_v41 }
  0x26   :  { %270 = vmatmul.mubr.f32.vlgmr.msra.gmra.mrb[0].mxu1 %v17_v43  ;;  %556 = vmatpush3.bf16.msra.mxu0 %v555_v42 }
  0x27   :  { %8 = vsyncpa [#allocation3], 0  ;;  %593 = vmatpush3.bf16.msra.mxu1 %v555_v42  ;;  %558 = vmatprep.subr.bf16.mxu0 %v557_v44  ;;  %v561_v53 = vpack.c.bf16 %v112_v48, %v111_v47  ;;  %v95_v54 = vld [vmem:[%s991_s1 + $0x220] sm:$0xff]  ;;  %v96_v55 = vld [vmem:[%s991_s1 + $0x228] sm:$0xff]  ;;  %vm355_vm0 = vcmask 261120  }
  0x28   :  { %v23_v56 = vld [vmem:[%s990_s0 + $0x40] sm:$0xff]  ;;  %586 = vmatprep.subr.bf16.mxu1 %v557_v44  ;;  %v113_v57 = vld [vmem:[%s991_s1 + $0x2b0] sm:$0xff]  ;;  %v114_v58 = vld [vmem:[%s991_s1 + $0x2b8] sm:$0xff]  ;;  %199 = vmatprep.mubr.f32.mxu0 %v22_v49  ;;  %v563_v60 = vpack.c.bf16 %v96_v55, %v95_v54 }
  0x29   :  { %200 = vmatmul.mubr.f32.gmra.mrb[2].mxu0 %v21_v51  ;;  %274 = vmatprep.mubr.f32.mxu1 %v24_v52  ;;  %v20_v59 = vld [vmem:[%s990_s0 + $0x28] sm:$0xff]  ;;  %v26_v61 = vld [vmem:[%s990_s0 + $0x58] sm:$0xff]  ;;  %v565_v62 = vpack.c.bf16 %v114_v58, %v113_v57  ;;  %v97_v63 = vld [vmem:[%s991_s1 + $0x230] sm:$0xff] }
  0x2a   :  { %560 = vmatpush3.bf16.msra.mxu0 %v559_v50  ;;  %275 = vmatmul.mubr.f32.gmra.mrb[2].mxu1 %v23_v56  ;;  %v98_v0 = vld [vmem:[%s991_s1 + $0x238] sm:$0xff]  ;;  %v115_v1 = vld [vmem:[%s991_s1 + $0x2c0] sm:$0xff]  ;;  %v116_v2 = vld [vmem:[%s991_s1 + $0x2c8] sm:$0xff] }
  0x2b   :  { %594 = vmatpush3.bf16.msra.mxu1 %v559_v50  ;;  %562 = vmatprep.subr.bf16.mxu0 %v561_v53  ;;  %v567_v3 = vpack.c.bf16 %v98_v0, %v97_v63  ;;  %v569_v4 = vpack.c.bf16 %v116_v2, %v115_v1  ;;  %v99_v5 = vld [vmem:[%s991_s1 + $0x240] sm:$0xff]  ;;  %v100_v6 = vld [vmem:[%s991_s1 + $0x248] sm:$0xff]  ;;  %v117_v7 = vld [vmem:[%s991_s1 + $0x2d0] sm:$0xff] }
  0x2c   :  { %587 = vmatprep.subr.bf16.mxu1 %v561_v53  ;;  %344 = vmatprep.mubr.f32.mxu0 %v20_v59  ;;  %v118_v8 = vld [vmem:[%s991_s1 + $0x2d8] sm:$0xff]  ;;  %v571_v9 = vpack.c.bf16 %v100_v6, %v99_v5  ;;  %v101_v11 = vld [vmem:[%s991_s1 + $0x250] sm:$0xff]  ;;  %v119_v13 = vld [vmem:[%s991_s1 + $0x2e0] sm:$0xff] }
  0x2d   :  { %349 = vmatprep.mubr.f32.mxu1 %v26_v61  ;;  %v573_v10 = vpack.c.bf16 %v118_v8, %v117_v7  ;;  %v102_v12 = vld [vmem:[%s991_s1 + $0x258] sm:$0xff]  ;;  %v120_v14 = vld [vmem:[%s991_s1 + $0x2e8] sm:$0xff]  ;;  %v103_v17 = vld [vmem:[%s991_s1 + $0x260] sm:$0xff] }
  0x2e   :  { %564 = vmatpush3.bf16.msra.mxu0 %v563_v60  ;;  %v575_v15 = vpack.c.bf16 %v102_v12, %v101_v11  ;;  %v577_v16 = vpack.c.bf16 %v120_v14, %v119_v13  ;;  %v104_v18 = vld [vmem:[%s991_s1 + $0x268] sm:$0xff]  ;;  %v121_v19 = vld [vmem:[%s991_s1 + $0x2f0] sm:$0xff]  ;;  %v122_v20 = vld [vmem:[%s991_s1 + $0x2f8] sm:$0xff] }
  0x2f   :  { %595 = vmatpush3.bf16.msra.mxu1 %v563_v60  ;;  %566 = vmatprep.subr.bf16.mxu0 %v565_v62  ;;  %v579_v21 = vpack.c.bf16 %v104_v18, %v103_v17  ;;  %v581_v22 = vpack.c.bf16 %v122_v20, %v121_v19  ;;  %v105_v23 = vld [vmem:[%s991_s1 + $0x270] sm:$0xff]  ;;  %v106_v24 = vld [vmem:[%s991_s1 + $0x278] sm:$0xff]  ;;  %v19_v26 = vld [vmem:[%s990_s0 + $0x20] sm:$0xff] }
  0x30   :  { %588 = vmatprep.subr.bf16.mxu1 %v565_v62  ;;  %v583_v25 = vpack.c.bf16 %v106_v24, %v105_v23  ;;  %v25_v27 = vld [vmem:[%s990_s0 + $0x50] sm:$0xff]  ;;  %v374_v30 = vld [vmem:[%s992_s2] ss:$0 sm:$0xff]  ;;  %s628_s0 = smov [#allocation2]  }
  0x31   :  { %s363_s13 = sshll.u32 %s628_s0, 4  ;;  %s364_s13 = int_to_ptr.vmem [resolvable:$true] %s363_s13 }
  0x32   :  { %568 = vmatpush3.bf16.msra.mxu0 %v567_v3  ;;  %s604_s2 = scalar_lea.vmem %s364_s13, 256  ;;  %p609_p1 = scmp.lt.s32.totalorder %s364_s13, %s364_s13 }
  0x33   :  { %596 = vmatpush3.bf16.msra.mxu1 %v567_v3  ;;  %570 = vmatprep.subr.bf16.mxu0 %v569_v4  ;;  %p605_p0 = scmp.ne.s32.totalorder %s364_s13, %s604_s2  ;;  %p610_p2 = scmp.lt.s32.totalorder %s604_s2, %s604_s2 }
  0x34   :  { %589 = vmatprep.subr.bf16.mxu1 %v569_v4 }
  0x35   :  { %p611_p3 = por %p610_p2, %p609_p1 }
  0x36   :  { %572 = vmatpush3.bf16.msra.mxu0 %v571_v9 }
  0x37   :  { %597 = vmatpush3.bf16.msra.mxu1 %v571_v9  ;;  %574 = vmatprep.subr.bf16.mxu0 %v573_v10  ;;  %p612_p4 = pnand %p611_p3, %p605_p0 }
  0x38   :  { %590 = vmatprep.subr.bf16.mxu1 %v573_v10 }
  0x3a   :  { %576 = vmatpush3.bf16.msra.mxu0 %v575_v15 }
  0x3b   :  { %598 = vmatpush3.bf16.msra.mxu1 %v575_v15  ;;  %578 = vmatprep.subr.bf16.mxu0 %v577_v16 }
  0x3c   :  { %591 = vmatprep.subr.bf16.mxu1 %v577_v16 }
  0x3e   :  { %580 = vmatpush3.bf16.msra.mxu0 %v579_v21 }
  0x3f   :  { %599 = vmatpush3.bf16.msra.mxu1 %v579_v21  ;;  %582 = vmatprep.subr.bf16.mxu0 %v581_v22 }
  0x40   :  { %592 = vmatprep.subr.bf16.mxu1 %v581_v22 }
  0x42   :  { %584 = vmatpush3.bf16.msra.mxu0 %v583_v25 }
  0x43   :  { %600 = vmatpush3.bf16.msra.mxu1 %v583_v25 }
  0x45   :  { %345 = vmatmul.mubr.f32.vlgmr.msra.gmra.mrb[4].mxu0 %v19_v26 }
  0x46   :  { %350 = vmatmul.mubr.f32.vlgmr.msra.gmra.mrb[4].mxu1 %v25_v27 }
  0xf8   :  { %v407_v28 = vpop.f32.mrb[0].mxu0 }
  0xf9   :  { %v445_v29 = vpop.f32.mrb[0].mxu1  ;;  %v408_v31 = vpop.f32.mrb[1].mxu0 }
  0xfa   :  { %v409_v32 = vadd.f32 %v408_v31, %v407_v28  ;;  %v446_v33 = vpop.f32.mrb[1].mxu1 }
  0xfb   :  { %v447_v34 = vadd.f32 %v446_v33, %v445_v29 }
  0xfc   :  { %v197_v35 = vadd.f32 %v409_v32, %v374_v30  ;;  %v410_v36 = vpop.f32.mrb[2].mxu0 }
  0xfd   :  { %v411_v37 = vpop.f32.mrb[3].mxu0  ;;  %v448_v38 = vpop.f32.mrb[2].mxu1 }
  0xfe   :  { %v272_v39 = vadd.f32 %v447_v34, %v197_v35  ;;  %v412_v40 = vadd.f32 %v411_v37, %v410_v36  ;;  %v449_v41 = vpop.f32.mrb[3].mxu1 }
  0xff   :  { %v450_v42 = vadd.f32 %v449_v41, %v448_v38 }
 0x100   :  { %v202_v43 = vadd.f32 %v412_v40, %v374_v30 }
 0x102   :  { %v277_v44 = vadd.f32 %v450_v42, %v202_v43 }
 0x118   :  { %v483_v45 = vpop.f32.mrb[4].mxu0 }
 0x119   :  { %v486_v46 = vpop.f32.mrb[4].mxu1  ;;  %v484_v47 = vpop.f32.mrb[5].mxu0 }
 0x11a   :  { %v485_v48 = vadd.f32 %v484_v47, %v483_v45  ;;  %v487_v49 = vpop.f32.mrb[5].mxu1 }
 0x11b   :  { %v488_v50 = vadd.f32 %v487_v49, %v486_v46 }
 0x11c   :  { %v347_v51 = vadd.f32 %v485_v48, %v272_v39 }
 0x11d   :  { %v352_v52 = vadd.f32 %v488_v50, %v277_v44 }
 0x11e   :  { %356 = vst.msk [vmem:[#allocation2] sm:$0xff] %vm355_vm0, %v347_v51 }
 0x11f   :  { %357 = vst.msk [vmem:[#allocation2 + $0x8] sm:$0xff] %vm355_vm0, %v352_v52 }
 0x120   :  { %615 = shalt.err (!%p612_p4)
}
 0x121   :  { %s616_s16 = scalar_lea.hbm %s993_s3, 256 }
 0x122   :  { %p617_p5 = scmp.ne.s32.totalorder %s993_s3, %s616_s16  ;;  %p620_p6 = scmp.lt.u32.totalorder %s616_s16, %s993_s3 }
 0x124   :  { %p622_p7 = pnand %p620_p6, %p617_p5 }
 0x126   :  { %625 = shalt.err (!%p622_p7)
}
 0x127   :  { %s629_s21 = smov 128   ;;  %s630_s22 = smov 8  }
 0x128   :  { %369 = dma.vmem_to_hbm [thread:$0]  %s364_s13, 256, %s993_s3, [#allocation3], %s629_s21, %s629_s21, %s630_s22  }
 0x129   :  { %626 = dma.done.wait [#allocation3], 256  }
 0x12a   :  { %627 = vsyncadd [#allocation3], 4294967040 }
 0x12b   :  { %373 = vsyncpa [#allocation3], 1 }

</bundles_post_ra>
